<compile_context>
chip_gen: v6e
topology: v6e:2x2x1
jax: 0.10.0
libtpu: 0.0.40
codegen_flags: <defaults>
</compile_context>

<pallas_src>
import functools
import math

import jax
import jax.numpy as jnp
from jax.experimental import pallas as pl
from jax.experimental.pallas import tpu as pltpu

LANES = 128
_SUBLANE_ALIGN = 32  # legal block row alignment for f32(8)/bf16(16)/int8(32)


def _round_up(x, m):
    return (x + m - 1) // m * m


def _focal_elements(x, t, alpha, gamma, logits, hard):
    """Elementwise focal loss; upcasts loaded tiles to f32."""
    x = x.astype(jnp.float32)
    t = t.astype(jnp.float32)

    if logits:
        # F.binary_cross_entropy_with_logits (numerically stable form)
        bce = jnp.maximum(x, 0.0) - x * t + jnp.log1p(jnp.exp(-jnp.abs(x)))
    else:
        # F.binary_cross_entropy; PyTorch clamps log terms at -100
        logp = jnp.maximum(jnp.log(x), -100.0)
        log1mp = jnp.maximum(jnp.log(1.0 - x), -100.0)
        bce = -(t * logp + (1.0 - t) * log1mp)

    if hard and not logits:
        # Hard {0,1} labels: pt = p^t (1-p)^(1-t) collapses to a select.
        # Saves one EUP exp/elem; differs from exp(-BCE) only where the -100
        # log clamp is active (p within ~e^-100 of 0 or 1).
        pt = jnp.where(t > 0.5, x, 1.0 - x)
    else:
        pt = jnp.exp(-bce)

    d = jnp.maximum(1.0 - pt, 0.0)

    g = float(gamma)
    if g == 0.0:
        mod = jnp.ones_like(d)
    elif g.is_integer() and 1 <= int(g) <= 8:
        # Repeated multiply instead of pow (pow -> exp(g*log(.)) = 2 extra EUP).
        mod = d
        for _ in range(int(g) - 1):
            mod = mod * d
    else:
        mod = d ** g
    return alpha * mod * bce


def _focal_sum_kernel(x_ref, t_ref, psum_ref, *, alpha, gamma, logits, hard,
                      n_valid, mask_needed):
    """Per-block partial sums: (brows, 128) tile -> one (8, 128) partial."""
    fl = _focal_elements(x_ref[...], t_ref[...], alpha, gamma, logits, hard)
    brows = fl.shape[0]

    def fold(v):
        # Fold the tile into one vreg-shaped (8,128) partial: pure VPU adds
        # between vregs (no XLU cross-lane reduce, no serializing scalar acc).
        return jnp.sum(v.reshape(brows // 8, 8, LANES), axis=0)

    if not mask_needed:
        psum_ref[0] = fold(fl)
    else:
        i = pl.program_id(0)
        last = pl.num_programs(0) - 1

        @pl.when(i != last)
        def _():
            # Steady-state blocks: no iota/compare/select work at all.
            psum_ref[0] = fold(fl)

        @pl.when(i == last)
        def _():
            # All invalid elements (zero pad and/or OOB garbage of a partial
            # last block) provably live in the final block.  Row/lane compare
            # avoids int32 overflow of a flat index for very large inputs.
            row0 = i * brows
            rid = jax.lax.broadcasted_iota(jnp.int32, fl.shape, 0) + row0
            lid = jax.lax.broadcasted_iota(jnp.int32, fl.shape, 1)
            full_rows = n_valid // LANES
            rem = n_valid % LANES
            valid = (rid < full_rows) | ((rid == full_rows) & (lid < rem))
            psum_ref[0] = fold(jnp.where(valid, fl, 0.0))


def _focal_elem_kernel(x_ref, t_ref, out_ref, *, alpha, gamma, logits, hard):
    fl = _focal_elements(x_ref[...], t_ref[...], alpha, gamma, logits, hard)
    out_ref[...] = fl.astype(out_ref.dtype)


def focal_loss(inputs, targets, *, alpha=1.0, gamma=2.0, logits=False,
               reduce=True, assume_hard_labels=False, block_rows=8192):
    """Focal loss over arbitrarily-shaped inputs/targets (flattened internally)."""
    inputs = jnp.asarray(inputs)
    targets = jnp.asarray(targets)
    assert inputs.shape == targets.shape, (inputs.shape, targets.shape)
    orig_shape = inputs.shape
    n = math.prod(orig_shape) if orig_shape else 1

    # Native dtypes go straight into the kernel (upcast on the loaded tile).
    if not jnp.issubdtype(inputs.dtype, jnp.floating):
        inputs = inputs.astype(jnp.float32)
    if targets.dtype == jnp.bool_:
        targets = targets.astype(jnp.int8)
    out_dtype = inputs.dtype

    x = inputs.reshape(-1)
    t = targets.reshape(-1)

    rem_lane = n % LANES
    if rem_lane:
        # Ragged tail only: pad the flat stream to a multiple of 128 lanes.
        # 128-aligned inputs (the common case) take the zero-copy reshape below.
        pad = LANES - rem_lane
        x = jnp.pad(x, (0, pad))
        t = jnp.pad(t, (0, pad))
    rows = (n + LANES - 1) // LANES
    x = x.reshape(rows, LANES)
    t = t.reshape(rows, LANES)

    brows = min(_round_up(int(block_rows), _SUBLANE_ALIGN),
                _round_up(rows, _SUBLANE_ALIGN))
    num_blocks = -(-rows // brows)

    # logits=False zero padding already yields exactly 0 loss, so the in-kernel
    # mask is only needed for OOB rows of a partial last block, or for in-array
    # zero padding on the logits path.
    oob_rows = num_blocks * brows > rows
    zero_pad = rows * LANES > n
    mask_needed = oob_rows or (zero_pad and bool(logits))

    cparams = pltpu.CompilerParams(
        dimension_semantics=("parallel",),          # nothing resident across grid
        vmem_limit_bytes=48 * 1024 * 1024,          # fits 8192-row tiles everywhere
    )

    if reduce:
        kernel = functools.partial(
            _focal_sum_kernel, alpha=float(alpha), gamma=float(gamma),
            logits=bool(logits), hard=bool(assume_hard_labels),
            n_valid=n, mask_needed=mask_needed)
        psums = pl.pallas_call(
            kernel,
            out_shape=jax.ShapeDtypeStruct((num_blocks, 8, LANES), jnp.float32),
            grid_spec=pltpu.PrefetchScalarGridSpec(
                num_scalar_prefetch=0,
                grid=(num_blocks,),
                in_specs=[
                    pl.BlockSpec((brows, LANES), lambda i: (i, 0)),
                    pl.BlockSpec((brows, LANES), lambda i: (i, 0)),
                ],
                out_specs=pl.BlockSpec((1, 8, LANES), lambda i: (i, 0, 0)),
            ),
            compiler_params=cparams,
        )(x, t)
        # Tiny final reduction (num_blocks * 1024 f32) + mean over true count.
        return jnp.sum(psums) / jnp.float32(n)

    kernel = functools.partial(
        _focal_elem_kernel, alpha=float(alpha), gamma=float(gamma),
        logits=bool(logits), hard=bool(assume_hard_labels))
    fl = pl.pallas_call(
        kernel,
        out_shape=jax.ShapeDtypeStruct((rows, LANES), out_dtype),
        grid_spec=pltpu.PrefetchScalarGridSpec(
            num_scalar_prefetch=0,
            grid=(num_blocks,),
            in_specs=[
                pl.BlockSpec((brows, LANES), lambda i: (i, 0)),
                pl.BlockSpec((brows, LANES), lambda i: (i, 0)),
            ],
            out_specs=pl.BlockSpec((brows, LANES), lambda i: (i, 0)),
        ),
        compiler_params=cparams,
    )(x, t)
    if rem_lane:
        return fl.reshape(-1)[:n].reshape(orig_shape)
    return fl.reshape(orig_shape)           # zero-copy reshape, no slice


def _focal_loss_ref(inputs, targets, alpha=1.0, gamma=2.0, logits=False, reduce=True):
    inputs = jnp.asarray(inputs, jnp.float32)
    targets = jnp.asarray(targets, jnp.float32)
    if logits:
        bce = (jnp.maximum(inputs, 0.0) - inputs * targets
               + jnp.log1p(jnp.exp(-jnp.abs(inputs))))
    else:
        bce = -(targets * jnp.maximum(jnp.log(inputs), -100.0)
                + (1.0 - targets) * jnp.maximum(jnp.log(1.0 - inputs), -100.0))
    pt = jnp.exp(-bce)
    fl = alpha * (1.0 - pt) ** gamma * bce
    return jnp.mean(fl) if reduce else fl


if __name__ == "__main__":
    key = jax.random.PRNGKey(0)
    k1, k2, k3, k4 = jax.random.split(key, 4)

    # Case 1: lane-aligned probabilities, reduce=True (zero-copy path, no mask).
    R, C = 16, 128
    probs = jax.nn.sigmoid(jax.random.normal(k1, (R, C), dtype=jnp.float32))
    tgts = (jax.random.uniform(k2, (R, C)) > 0.5).astype(jnp.float32)
    out1 = jax.block_until_ready(focal_loss(probs, tgts))
    ref1 = _focal_loss_ref(probs, tgts)
    assert jnp.allclose(out1, ref1, rtol=1e-5, atol=1e-6), (out1, ref1)

    # Case 2: logits path, ragged shape (padding + last-block masking).
    shape2 = (3, 5, 7)
    logit_in = jax.random.normal(k3, shape2, dtype=jnp.float32)
    tgts2 = (jax.random.uniform(k4, shape2) > 0.5).astype(jnp.float32)
    out2 = jax.block_until_ready(focal_loss(logit_in, tgts2, logits=True))
    ref2 = _focal_loss_ref(logit_in, tgts2, logits=True)
    assert jnp.allclose(out2, ref2, rtol=1e-5, atol=1e-6), (out2, ref2)

    # Case 3: reduce=False elementwise path, non-integer gamma (pow branch).
    out3 = jax.block_until_ready(focal_loss(probs, tgts, gamma=1.5, reduce=False))
    ref3 = _focal_loss_ref(probs, tgts, gamma=1.5, reduce=False)
    assert out3.shape == (R, C)
    assert jnp.allclose(out3, ref3, rtol=1e-5, atol=1e-6)

    # Case 4: native bf16 inputs + bool targets, ragged but mask-free
    # (logits=False zero padding contributes exactly 0 to the sum).
    probs4 = jax.nn.sigmoid(jax.random.normal(k3, (40, 100))).astype(jnp.bfloat16)
    tgts4 = jax.random.uniform(k4, (40, 100)) > 0.5          # bool targets
    out4 = jax.block_until_ready(focal_loss(probs4, tgts4))
    ref4 = _focal_loss_ref(probs4.astype(jnp.float32), tgts4.astype(jnp.float32))
    assert jnp.allclose(out4, ref4, rtol=1e-4, atol=1e-5), (out4, ref4)

    # Case 5: hard-label pt shortcut (v7x EUP optimization, opt-in).
    out5 = jax.block_until_ready(focal_loss(probs, tgts, assume_hard_labels=True))
    assert jnp.allclose(out5, ref1, rtol=1e-5, atol=1e-6), (out5, ref1)

    print("KERNEL_OK")
</pallas_src>

<mosaic_0001>
module attributes {stable_mosaic.version = 11 : i64} {
  func.func @_focal_sum_kernel(%arg0: i32, %arg1: memref<32x128xf32, #tpu.memory_space<vmem>>, %arg2: memref<32x128xf32, #tpu.memory_space<vmem>>, %arg3: memref<1x8x128xf32, #tpu.memory_space<vmem>>) attributes {dimension_semantics = [#tpu.dimension_semantics<parallel>], iteration_bounds = array<i64: 1>, scalar_prefetch = 0 : i64, scratch_operands = 0 : i64, tpu.core_type = #tpu.core_type<tc>, window_params = [{transform_indices = @transform_0, window_bounds = array<i64: 32, 128>}, {transform_indices = @transform_1, window_bounds = array<i64: 32, 128>}, {transform_indices = @transform_2, window_bounds = array<i64: 1, 8, 128>}]} {
    %c0 = arith.constant 0 : index
    %c0_0 = arith.constant 0 : index
    %0 = vector.load %arg1[%c0, %c0_0] : memref<32x128xf32, #tpu.memory_space<vmem>>, vector<32x128xf32>
    %c0_1 = arith.constant 0 : index
    %c0_2 = arith.constant 0 : index
    %1 = vector.load %arg2[%c0_1, %c0_2] : memref<32x128xf32, #tpu.memory_space<vmem>>, vector<32x128xf32>
    %2 = math.log %0 : vector<32x128xf32>
    %cst = arith.constant -1.000000e+02 : f32
    %3 = vector.broadcast %cst : f32 to vector<32x128xf32>
    %4 = arith.maximumf %2, %3 : vector<32x128xf32>
    %cst_3 = arith.constant 1.000000e+00 : f32
    %5 = vector.broadcast %cst_3 : f32 to vector<32x128xf32>
    %6 = arith.subf %5, %0 : vector<32x128xf32>
    %7 = math.log %6 : vector<32x128xf32>
    %cst_4 = arith.constant -1.000000e+02 : f32
    %8 = vector.broadcast %cst_4 : f32 to vector<32x128xf32>
    %9 = arith.maximumf %7, %8 : vector<32x128xf32>
    %10 = arith.mulf %1, %4 : vector<32x128xf32>
    %cst_5 = arith.constant 1.000000e+00 : f32
    %11 = vector.broadcast %cst_5 : f32 to vector<32x128xf32>
    %12 = arith.subf %11, %1 : vector<32x128xf32>
    %13 = arith.mulf %12, %9 : vector<32x128xf32>
    %14 = arith.addf %10, %13 : vector<32x128xf32>
    %cst_6 = arith.constant 0.000000e+00 : f32
    %15 = vector.broadcast %cst_6 : f32 to vector<32x128xf32>
    %16 = arith.subf %15, %14 : vector<32x128xf32>
    %cst_7 = arith.constant 0.000000e+00 : f32
    %17 = vector.broadcast %cst_7 : f32 to vector<32x128xf32>
    %18 = arith.subf %17, %16 : vector<32x128xf32>
    %19 = math.exp %18 : vector<32x128xf32>
    %cst_8 = arith.constant 1.000000e+00 : f32
    %20 = vector.broadcast %cst_8 : f32 to vector<32x128xf32>
    %21 = arith.subf %20, %19 : vector<32x128xf32>
    %cst_9 = arith.constant 0.000000e+00 : f32
    %22 = vector.broadcast %cst_9 : f32 to vector<32x128xf32>
    %23 = arith.maximumf %21, %22 : vector<32x128xf32>
    %24 = arith.mulf %23, %23 : vector<32x128xf32>
    %cst_10 = arith.constant 1.000000e+00 : f32
    %25 = vector.broadcast %cst_10 : f32 to vector<32x128xf32>
    %26 = arith.mulf %25, %24 : vector<32x128xf32>
    %27 = arith.mulf %26, %16 : vector<32x128xf32>
    %c0_i32 = arith.constant 0 : i32
    %28 = arith.cmpi ne, %arg0, %c0_i32 : i32
    %29 = arith.extui %28 : i1 to i32
    %c0_i32_11 = arith.constant 0 : i32
    %30 = arith.cmpi ne, %29, %c0_i32_11 : i32
    scf.if %30 {
      %34 = vector.shape_cast %27 : vector<32x128xf32> to vector<4x8x128xf32>
      %cst_14 = arith.constant dense<0.000000e+00> : vector<8x128xf32>
      %35 = vector.multi_reduction <add>, %34, %cst_14 [0] : vector<4x8x128xf32> to vector<8x128xf32>
      %c0_15 = arith.constant 0 : index
      %c0_16 = arith.constant 0 : index
      %c0_17 = arith.constant 0 : index
      %36 = vector.load %arg3[%c0_15, %c0_16, %c0_17] : memref<1x8x128xf32, #tpu.memory_space<vmem>>, vector<1x8x128xf32>
      %37 = vector.shape_cast %36 : vector<1x8x128xf32> to vector<8x128xf32>
      %38 = vector.shape_cast %35 : vector<8x128xf32> to vector<1x8x128xf32>
      tpu.vector_store %arg3[%c0_15, %c0_16, %c0_17], %38 {strides = array<i32>} : memref<1x8x128xf32, #tpu.memory_space<vmem>>, vector<1x8x128xf32>,
    } else {
    }
    %c0_i32_12 = arith.constant 0 : i32
    %31 = arith.cmpi eq, %arg0, %c0_i32_12 : i32
    %32 = arith.extui %31 : i1 to i32
    %c0_i32_13 = arith.constant 0 : i32
    %33 = arith.cmpi ne, %32, %c0_i32_13 : i32
    scf.if %33 {
      %c32_i32 = arith.constant 32 : i32
      %34 = arith.muli %arg0, %c32_i32 : i32
      %35 = tpu.iota {dimensions = array<i32: 0>} : vector<32x128xi32>
      %36 = vector.broadcast %34 : i32 to vector<32x128xi32>
      %37 = arith.addi %35, %36 : vector<32x128xi32>
      %38 = tpu.iota {dimensions = array<i32: 1>} : vector<32x128xi32>
      %c16_i32 = arith.constant 16 : i32
      %39 = vector.broadcast %c16_i32 : i32 to vector<32x128xi32>
      %40 = arith.cmpi slt, %37, %39 : vector<32x128xi32>
      %c16_i32_14 = arith.constant 16 : i32
      %41 = vector.broadcast %c16_i32_14 : i32 to vector<32x128xi32>
      %42 = arith.cmpi eq, %37, %41 : vector<32x128xi32>
      %c0_i32_15 = arith.constant 0 : i32
      %43 = vector.broadcast %c0_i32_15 : i32 to vector<32x128xi32>
      %44 = arith.cmpi slt, %38, %43 : vector<32x128xi32>
      %45 = arith.andi %42, %44 : vector<32x128xi1>
      %46 = arith.ori %40, %45 : vector<32x128xi1>
      %cst_16 = arith.constant 0.000000e+00 : f32
      %47 = vector.broadcast %cst_16 : f32 to vector<32x128xf32>
      %48 = arith.select %46, %27, %47 : vector<32x128xi1>, vector<32x128xf32>
      %49 = vector.shape_cast %48 : vector<32x128xf32> to vector<4x8x128xf32>
      %cst_17 = arith.constant dense<0.000000e+00> : vector<8x128xf32>
      %50 = vector.multi_reduction <add>, %49, %cst_17 [0] : vector<4x8x128xf32> to vector<8x128xf32>
      %c0_18 = arith.constant 0 : index
      %c0_19 = arith.constant 0 : index
      %c0_20 = arith.constant 0 : index
      %51 = vector.load %arg3[%c0_18, %c0_19, %c0_20] : memref<1x8x128xf32, #tpu.memory_space<vmem>>, vector<1x8x128xf32>
      %52 = vector.shape_cast %51 : vector<1x8x128xf32> to vector<8x128xf32>
      %53 = vector.shape_cast %50 : vector<8x128xf32> to vector<1x8x128xf32>
      tpu.vector_store %arg3[%c0_18, %c0_19, %c0_20], %53 {strides = array<i32>} : memref<1x8x128xf32, #tpu.memory_space<vmem>>, vector<1x8x128xf32>,
    } else {
    }
    return
  }
  func.func @transform_0(%arg0: i32) -> (i32, i32) {
    %c0_i32 = arith.constant 0 : i32
    %c0_i32_0 = arith.constant 0 : i32
    return %arg0, %c0_i32 : i32, i32
  }
  func.func @transform_1(%arg0: i32) -> (i32, i32) {
    %c0_i32 = arith.constant 0 : i32
    %c0_i32_0 = arith.constant 0 : i32
    return %arg0, %c0_i32 : i32, i32
  }
  func.func @transform_2(%arg0: i32) -> (i32, i32, i32) {
    %c0_i32 = arith.constant 0 : i32
    %c0_i32_0 = arith.constant 0 : i32
    %c0_i32_1 = arith.constant 0 : i32
    return %arg0, %c0_i32, %c0_i32_0 : i32, i32, i32
  }
}

</mosaic_0001>

<bundles_post_ra>
// kernel: tpu_custom_call.1
= control target key start
LH: loop header
LB: loop body
LE: loop exit
PB: predicated region body
PF: predicated region fallthrough
CT: control target
= control target key end

     0   :  { %7 = vsyncpa [#allocation3], 0  ;;  %s302_s0 = inlined_call_operand.hbm [shape: f32[16,128], index: 0, kind: input, shape index: {}]   ;;  %s303_s1 = inlined_call_operand.hbm [shape: f32[16,128], index: 1, kind: input, shape index: {}]   ;;  %s304_s2 = inlined_call_operand.hbm [shape: f32[1,8,128], index: 2, kind: output, shape index: {}]  }
   0x1   :  { %8 = vsyncpa [#allocation6], 0 }
   0x2   :  { %9 = vsyncpa [#allocation4], 0 }
   0x3   :  { %14 = vsyncadd [#allocation3], 256  ;;  %s273_s9 = smov [#allocation2]  }
   0x4   :  { %s15_s10 = sshll.u32 %s273_s9, 4  ;;  %s16_s10 = int_to_ptr.vmem [resolvable:$true] %s15_s10 }
   0x5   :  { %s215_s11 = scalar_lea.vmem %s16_s10, 256  ;;  %s219_s12 = scalar_lea.vmem %s16_s10, 512 }
   0x6   :  { %p216_p0 = scmp.ne.s32.totalorder %s16_s10, %s215_s11  ;;  %p220_p1 = scmp.lt.s32.totalorder %s16_s10, %s16_s10 }
   0x7   :  { %p221_p2 = scmp.lt.s32.totalorder %s219_s12, %s215_s11 }
   0x9   :  { %p222_p3 = por %p221_p2, %p220_p1 }
   0xb   :  { %p223_p4 = pnand %p222_p3, %p216_p0 }
   0xd   :  { %226 = shalt.err (!%p223_p4)
}
   0xe   :  { %s274_s13 = smov 128   ;;  %s275_s14 = smov 8  }
   0xf   :  { %21 = dma.hbm_to_vmem [thread:$0]  %s302_s0, 256, %s16_s10, [#allocation3], %s274_s13, %s274_s13, %s275_s14  }
  0x10   :  { %26 = vsyncadd [#allocation6], 256  ;;  %s276_s17 = smov [#allocation5]  }
  0x11   :  { %s27_s18 = sshll.u32 %s276_s17, 4  ;;  %s28_s18 = int_to_ptr.vmem [resolvable:$true] %s27_s18 }
  0x12   :  { %s235_s19 = scalar_lea.vmem %s28_s18, 256  ;;  %s239_s20 = scalar_lea.vmem %s28_s18, 512 }
  0x13   :  { %p236_p5 = scmp.ne.s32.totalorder %s28_s18, %s235_s19  ;;  %p240_p6 = scmp.lt.s32.totalorder %s28_s18, %s28_s18 }
  0x14   :  { %p241_p7 = scmp.lt.s32.totalorder %s239_s20, %s235_s19 }
  0x16   :  { %p242_p8 = por %p241_p7, %p240_p6 }
  0x18   :  { %p243_p9 = pnand %p242_p8, %p236_p5 }
  0x1a   :  { %246 = shalt.err (!%p243_p9)
}
  0x1b   :  { %33 = dma.hbm_to_vmem [thread:$0]  %s303_s1, 256, %s28_s18, [#allocation6], %s274_s13, %s274_s13, %s275_s14  }
  0x1c   :  { %267 = dma.done.wait [#allocation3], 512  }
  0x1d   :  { %268 = vsyncadd [#allocation3], 4294966784 }
  0x1e   :  { %269 = dma.done.wait [#allocation6], 512  }
  0x1f   :  { %270 = vsyncadd [#allocation6], 4294966784  ;;  %v40_v0 = vld [vmem:[#allocation2] sm:$0xff]  ;;  %v41_v1 = vld [vmem:[#allocation2 + $0x8] sm:$0xff]  ;;  %s277_s0 = smov [#allocation7]  }
  0x20   :  { %195 = vlog2.f32 %v40_v0  ;;  %v60_v2 = vsub.f32 1.0, %v40_v0  ;;  %v61_v3 = vsub.f32 1.0, %v41_v1  ;;  %v44_v5 = vld [vmem:[#allocation5] sm:$0xff]  ;;  %v45_v7 = vld [vmem:[#allocation5 + $0x8] sm:$0xff]  ;;  %s180_s1 = sshll.u32 %s277_s0, 4  ;;  %s181_s1 = int_to_ptr.vmem [resolvable:$true] %s180_s1 }
  0x21   :  { %197 = vlog2.f32 %v41_v1  ;;  %v80_v14 = vsub.f32 1.0, %v44_v5  ;;  %v81_v17 = vsub.f32 1.0, %v45_v7  ;;  %s247_s23 = scalar_lea.vmem %s181_s1, 128  ;;  %p252_p11 = scmp.lt.s32.totalorder %s181_s1, %s181_s1 }
  0x22   :  { %199 = vlog2.f32 %v60_v2  ;;  %p248_p10 = scmp.ne.s32.totalorder %s181_s1, %s247_s23  ;;  %p253_p12 = scmp.lt.s32.totalorder %s247_s23, %s247_s23 }
  0x23   :  { %201 = vlog2.f32 %v61_v3 }
  0x24   :  { %p254_p13 = por %p253_p12, %p252_p11 }
  0x26   :  { %p255_p0 = pnand %p254_p13, %p248_p10 }
  0x2d   :  { %v196_v4 = vpop.eup %195 }
  0x2e   :  { %v198_v6 = vpop.eup %197  ;;  %v49_v8 = vmul.f32 0.6931472, %v196_v4 }
  0x2f   :  { %v200_v9 = vpop.eup %199  ;;  %v51_v10 = vmul.f32 0.6931472, %v198_v6 }
  0x30   :  { %v202_v11 = vpop.eup %201  ;;  %v56_v12 = vmax.f32 %v49_v8, -100.0  ;;  %v65_v13 = vmul.f32 0.6931472, %v200_v9 }
  0x31   :  { %v57_v15 = vmax.f32 %v51_v10, -100.0  ;;  %v67_v16 = vmul.f32 0.6931472, %v202_v11 }
  0x32   :  { %v72_v18 = vmax.f32 %v65_v13, -100.0  ;;  %v76_v19 = vmul.f32 %v56_v12, %v44_v5 }
  0x33   :  { %v73_v20 = vmax.f32 %v67_v16, -100.0  ;;  %v77_v21 = vmul.f32 %v57_v15, %v45_v7 }
  0x34   :  { %v84_v22 = vmul.f32 %v80_v14, %v72_v18 }
  0x35   :  { %v85_v23 = vmul.f32 %v81_v17, %v73_v20 }
  0x36   :  { %v88_v24 = vadd.f32 %v84_v22, %v76_v19 }
  0x37   :  { %v89_v25 = vadd.f32 %v85_v23, %v77_v21 }
  0x38   :  { %v92_v26 = vsub.f32 0.0, %v88_v24 }
  0x39   :  { %v93_v27 = vsub.f32 0.0, %v89_v25 }
  0x3a   :  { %v96_v28 = vsub.f32 0.0, %v92_v26 }
  0x3b   :  { %v97_v29 = vsub.f32 0.0, %v93_v27 }
  0x3c   :  { %v100_v30 = vmul.f32 1.442695, %v96_v28 }
  0x3d   :  { %v102_v31 = vmul.f32 1.442695, %v97_v29 }
  0x3e   :  { %203 = vpow2.f32 %v100_v30 }
  0x3f   :  { %205 = vpow2.f32 %v102_v31 }
  0x4b   :  { %v204_v32 = vpop.eup %203 }
  0x4c   :  { %v206_v33 = vpop.eup %205  ;;  %v108_v34 = vsub.f32 1.0, %v204_v32 }
  0x4d   :  { %v109_v35 = vsub.f32 1.0, %v206_v33 }
  0x4e   :  { %v112_v36 = vmax.f32 %v108_v34, 0.0 }
  0x4f   :  { %v113_v37 = vmax.f32 %v109_v35, 0.0 }
  0x50   :  { %v116_v38 = vmul.f32 %v112_v36, %v112_v36 }
  0x51   :  { %v117_v39 = vmul.f32 %v113_v37, %v113_v37 }
  0x52   :  { %v120_v40 = vmul.f32 %v116_v38, %v92_v26 }
  0x53   :  { %v121_v41 = vmul.f32 %v117_v39, %v93_v27 }
  0x55   :  { %v170_v42 = vadd.f32 %v121_v41, %v120_v40 }
  0x57   :  { %173 = vst [vmem:[#allocation7] sm:$0xff] %v170_v42 }
  0x58   :  { %258 = shalt.err (!%p255_p0)
}
  0x59   :  { %183 = dma.vmem_to_hbm [thread:$0]  %s181_s1, 128, %s304_s2, [#allocation4]  }
  0x5a   :  { %271 = dma.done.wait [#allocation4], 128  }
  0x5b   :  { %272 = vsyncadd [#allocation4], 4294967168 }
  0x5c   :  { %187 = vsyncpa [#allocation3], 1 }
  0x5d   :  { %188 = vsyncpa [#allocation6], 1 }
  0x5e   :  { %189 = vsyncpa [#allocation4], 1 }

</bundles_post_ra>
